<compile_context>
chip_gen: v6e
topology: v6e:2x2x1
jax: 0.10.0
libtpu: 0.0.40
codegen_flags: <defaults>
</compile_context>

<pallas_src>
import jax
import jax.numpy as jnp
from jax.experimental import pallas as pl
from jax.experimental.pallas import tpu as pltpu

NEG_SLOPE = 0.2


def _upsize_kernel(x_ref, w_ref, b_ref, o_ref):
    # x_ref: (Cin, TM)        -- one spatial tile of one batch element
    # w_ref: (4*Cout, Cin)    -- resident across the grid
    # b_ref: (4*Cout, 1)
    # o_ref: (4*Cout, TM)     -- lane dim = TM >= 128 -> unmasked stores
    y = jnp.dot(w_ref[...], x_ref[...], preferred_element_type=jnp.float32)
    y = y + b_ref[...]
    y = jnp.where(y > 0, y, NEG_SLOPE * y)  # LeakyReLU(0.2)
    o_ref[...] = y.astype(o_ref.dtype)


def _round_up(x, m):
    return pl.cdiv(x, m) * m


def upsizing_block(x_nchw, weight, bias, *, tm_cap=1024):
    """Forward pass of UpsizingBlock.

    x_nchw: (N, Cin, H, W) float32
    weight: (Cin, Cout, 2, 2) float32   (PyTorch ConvTranspose2d layout)
    bias:   (Cout,) float32
    returns (N, Cout, 2H, 2W) float32
    """
    N, Cin, H, W = x_nchw.shape
    Cout = weight.shape[1]
    C4 = 4 * Cout
    HW = H * W

    # Free (no data movement) reshape: spatial becomes the lane axis.
    x_flat = x_nchw.reshape(N, Cin, HW)

    # Weight (Cin, Cout, kh, kw) -> (4*Cout, Cin), row order (co, kh, kw). Tiny.
    w_flat = jnp.transpose(weight, (1, 2, 3, 0)).reshape(C4, Cin)
    # Bias replicated per kernel position: b4[co*4 + kh*2 + kw] = bias[co].
    b_flat = jnp.repeat(bias, 4).reshape(C4, 1)

    # Spatial tile: multiple of 128 lanes, capped; pad HW up to a multiple of
    # TM (padded columns are computed then sliced off -> no OOB tail reads).
    TM = min(tm_cap, _round_up(HW, 128))
    HWp = _round_up(HW, TM)
    if HWp != HW:
        x_flat = jnp.pad(x_flat, ((0, 0), (0, 0), (0, HWp - HW)))

    grid = (N, HWp // TM)

    cost = pl.CostEstimate(
        flops=2 * N * HWp * Cin * C4 + 2 * N * HWp * C4,
        transcendentals=0,
        bytes_accessed=4 * (N * Cin * HWp + C4 * Cin + C4 + N * C4 * HWp),
    )

    out_flat = pl.pallas_call(
        _upsize_kernel,
        out_shape=jax.ShapeDtypeStruct((N, C4, HWp), x_nchw.dtype),
        grid=grid,
        in_specs=[
            pl.BlockSpec((None, Cin, TM), lambda n, m: (n, 0, m)),  # x tile
            pl.BlockSpec((C4, Cin), lambda n, m: (0, 0)),           # weight
            pl.BlockSpec((C4, 1), lambda n, m: (0, 0)),             # bias
        ],
        out_specs=pl.BlockSpec((None, C4, TM), lambda n, m: (n, 0, m)),
        compiler_params=pltpu.CompilerParams(
            dimension_semantics=("parallel", "parallel"),
        ),
        cost_estimate=cost,
    )(x_flat, w_flat, b_flat)

    # Glue: interleave the 4 kernel positions into the upsized spatial grid.
    # (N, 4*Cout, HW) -> (N, Cout, kh, kw, H, W) -> (N, Cout, H, kh, W, kw)
    out = out_flat[:, :, :HW].reshape(N, Cout, 2, 2, H, W)
    out = jnp.transpose(out, (0, 1, 4, 2, 5, 3))
    return out.reshape(N, Cout, 2 * H, 2 * W)


def _reference_forward(x, weight, bias):
    """Pure-JAX reference of ConvTranspose2d(k=2, s=2) + LeakyReLU(0.2)."""
    N, Cin, H, W = x.shape
    Cout = weight.shape[1]
    y = jnp.einsum("nchw,cokl->nohkwl", x, weight)
    y = y.reshape(N, Cout, 2 * H, 2 * W) + bias[None, :, None, None]
    return jnp.where(y > 0, y, NEG_SLOPE * y)


if __name__ == "__main__":
    key = jax.random.PRNGKey(0)
    k_x, k_w, k_b = jax.random.split(key, 3)

    N, Cin, Cout, H, W = 2, 4, 8, 16, 16

    x = jax.random.normal(k_x, (N, Cin, H, W), dtype=jnp.float32)
    # Deterministic synthetic parameters matching ConvTranspose2d shapes.
    weight = jax.random.normal(k_w, (Cin, Cout, 2, 2), dtype=jnp.float32) * 0.1
    bias = jax.random.normal(k_b, (Cout,), dtype=jnp.float32) * 0.1

    out = jax.block_until_ready(upsizing_block(x, weight, bias))
    ref = jax.block_until_ready(_reference_forward(x, weight, bias))

    assert out.shape == (N, Cout, 2 * H, 2 * W), out.shape
    assert jnp.allclose(out, ref, atol=1e-5, rtol=1e-5), "mismatch vs reference"
    print("KERNEL_OK")
</pallas_src>

<mosaic_0001>
module attributes {stable_mosaic.version = 11 : i64} {
  func.func @_upsize_kernel(%arg0: i32, %arg1: i32, %arg2: memref<1x4x256xf32, #tpu.memory_space<vmem>>, %arg3: memref<32x4xf32, #tpu.memory_space<vmem>>, %arg4: memref<32x1xf32, #tpu.memory_space<vmem>>, %arg5: memref<1x32x256xf32, #tpu.memory_space<vmem>>) attributes {dimension_semantics = [#tpu.dimension_semantics<parallel>, #tpu.dimension_semantics<parallel>], iteration_bounds = array<i64: 2, 1>, scalar_prefetch = 0 : i64, scratch_operands = 0 : i64, tpu.core_type = #tpu.core_type<tc>, window_params = [{transform_indices = @transform_0, window_bounds = array<i64: 1, 4, 256>}, {pipeline_mode = #tpu.pipeline_mode<synchronous>, transform_indices = @transform_1, window_bounds = array<i64: 32, 4>}, {pipeline_mode = #tpu.pipeline_mode<synchronous>, transform_indices = @transform_2, window_bounds = array<i64: 32, 1>}, {transform_indices = @transform_3, window_bounds = array<i64: 1, 32, 256>}]} {
    %c0 = arith.constant 0 : index
    %c0_0 = arith.constant 0 : index
    %0 = vector.load %arg3[%c0, %c0_0] : memref<32x4xf32, #tpu.memory_space<vmem>>, vector<32x4xf32>
    %c0_1 = arith.constant 0 : index
    %c0_2 = arith.constant 0 : index
    %c0_3 = arith.constant 0 : index
    %1 = vector.load %arg2[%c0_1, %c0_2, %c0_3] : memref<1x4x256xf32, #tpu.memory_space<vmem>>, vector<1x4x256xf32>
    %2 = vector.shape_cast %1 : vector<1x4x256xf32> to vector<4x256xf32>
    %cst = arith.constant dense<0.000000e+00> : vector<32x256xf32>
    %3 = tpu.matmul %0, %2, %cst {dimension_numbers = #tpu.dot_dimension_numbers<[1], [0], [0], [1], [0, 0, 1, 1], [], []>} : vector<32x4xf32>, vector<4x256xf32>, vector<32x256xf32> -> vector<32x256xf32>
    %c0_4 = arith.constant 0 : index
    %c0_5 = arith.constant 0 : index
    %4 = vector.load %arg4[%c0_4, %c0_5] : memref<32x1xf32, #tpu.memory_space<vmem>>, vector<32x1xf32>
    %5 = vector.broadcast %4 : vector<32x1xf32> to vector<32x256xf32>
    %6 = arith.addf %3, %5 : vector<32x256xf32>
    %cst_6 = arith.constant 0.000000e+00 : f32
    %7 = vector.broadcast %cst_6 : f32 to vector<32x256xf32>
    %8 = arith.cmpf ogt, %6, %7 : vector<32x256xf32>
    %cst_7 = arith.constant 2.000000e-01 : f32
    %9 = vector.broadcast %cst_7 : f32 to vector<32x256xf32>
    %10 = arith.mulf %9, %6 : vector<32x256xf32>
    %11 = arith.select %8, %6, %10 : vector<32x256xi1>, vector<32x256xf32>
    %c0_8 = arith.constant 0 : index
    %c0_9 = arith.constant 0 : index
    %c0_10 = arith.constant 0 : index
    %12 = vector.load %arg5[%c0_8, %c0_9, %c0_10] : memref<1x32x256xf32, #tpu.memory_space<vmem>>, vector<1x32x256xf32>
    %13 = vector.shape_cast %12 : vector<1x32x256xf32> to vector<32x256xf32>
    %14 = vector.shape_cast %11 : vector<32x256xf32> to vector<1x32x256xf32>
    tpu.vector_store %arg5[%c0_8, %c0_9, %c0_10], %14 {strides = array<i32>} : memref<1x32x256xf32, #tpu.memory_space<vmem>>, vector<1x32x256xf32>,
    return
  }
  func.func @transform_0(%arg0: i32, %arg1: i32) -> (i32, i32, i32) {
    %c0_i32 = arith.constant 0 : i32
    %c0_i32_0 = arith.constant 0 : i32
    return %arg0, %c0_i32, %arg1 : i32, i32, i32
  }
  func.func @transform_1(%arg0: i32, %arg1: i32) -> (i32, i32) {
    %c0_i32 = arith.constant 0 : i32
    %c0_i32_0 = arith.constant 0 : i32
    %c0_i32_1 = arith.constant 0 : i32
    return %c0_i32, %c0_i32_0 : i32, i32
  }
  func.func @transform_2(%arg0: i32, %arg1: i32) -> (i32, i32) {
    %c0_i32 = arith.constant 0 : i32
    %c0_i32_0 = arith.constant 0 : i32
    %c0_i32_1 = arith.constant 0 : i32
    return %c0_i32, %c0_i32_0 : i32, i32
  }
  func.func @transform_3(%arg0: i32, %arg1: i32) -> (i32, i32, i32) {
    %c0_i32 = arith.constant 0 : i32
    %c0_i32_0 = arith.constant 0 : i32
    return %arg0, %c0_i32, %arg1 : i32, i32, i32
  }
}

</mosaic_0001>

<bundles_post_ra>
// kernel: tpu_custom_call.1
= control target key start
LH: loop header
LB: loop body
LE: loop exit
PB: predicated region body
PF: predicated region fallthrough
CT: control target
= control target key end

     0   :  { %8 = vsyncpa [#allocation3], 0  ;;  %s808_s0 = inlined_call_operand.vmem [shape: f32[2,4,256], index: 0, kind: input, shape index: {}]   ;;  %s809_s1 = inlined_call_operand.vmem [shape: f32[32,4], index: 1, kind: input, shape index: {}]   ;;  %s810_s2 = inlined_call_operand.vmem [shape: f32[32,1], index: 2, kind: input, shape index: {}]   ;;  %s811_s3 = inlined_call_operand.hbm [shape: f32[2,32,256], index: 3, kind: output, shape index: {}]  }
   0x1   :  { %10 = vsyncpa [#allocation3 + $0x1], 0  ;;  %s653_s12 = smov 0   ;;  %s655_s13 = smov 0  }
   0x2   :  { %s657_s14 = smov 0   ;;  %s659_s15 = smov 0  }
   0x3   :  { %s661_s16 = smov 0   ;;  %s663_s17 = smov 0  }
   0x4 LB: > { %s465_s18 = sadd.s32 4294967295, %s626_s17   ;;  %s466_s19 = sadd.s32 4294967294, %s626_s17   ;;  %s626_s17 = sphi %s663_s17, %s16_s17   ;;  %s622_s16 = sphi %s661_s16, %s818_s16   ;;  %s618_s15 = sphi %s659_s15, %s817_s15   ;;  %s614_s14 = sphi %s657_s14, %s816_s14   ;;  %s610_s13 = sphi %s655_s13, %s815_s13   ;;  %s606_s12 = sphi %s653_s12, %s814_s12  }
   0x5   : > { %s28_s20 = sadd.s32 1, %s622_s16  ;;  %s107_s21 = sadd.s32 1, %s614_s14 }
   0x6   : > { %p30_p0 = scmp.ge.s32.totalorder %s28_s20, 2  ;;  %p117_p1 = scmp.ne.s32.totalorder %s614_s14, %s610_s13 }
   0x7   : > { %p118_p2 = scmp.eq.s32.totalorder %s465_s18, 1  ;;  %p123_p3 = scmp.ne.s32.totalorder %s610_s13, %s606_s12 }
   0x8   : > { %s820_s20 = smov (%p30_p0, %s28_s20), 0  ;;  %p124_p5 = scmp.eq.s32.totalorder %s466_s19, 1 }
   0x9   : > { %p693_p4 = por %p118_p2, %p117_p1  ;;  %s102_s23 = ssub.s32 %s622_s16, %s820_s20 }
   0xa   : > { %p469_p6 = scmp.ge.s32.totalorder %s626_s17, 1  ;;  %p105_p7 = scmp.eq.s32.totalorder %s102_s23, 0 }
   0xb   : > { %p700_p8 = por %p124_p5, %p123_p3  ;;  %p161_p9 = scmp.lt.s32.totalorder %s626_s17, 3 }
   0xc   : > { %s706_s25 = scalar_select %p105_p7, %s614_s14, %s107_s21  }
   0xd   : > { %p162_p10 = pnand %p469_p6, %p161_p9 }
   0xe   : > { %p190_p11 = scmp.lt.s32.totalorder (!%p162_p10), %s618_s15, 1  ;;  %s186_s30 = sand.u32 (!%p162_p10), 1, %s610_s13  }
   0xf   : > { %165 = sbr.rel (%p162_p10) target bundleno = 250 (0xfa), region = 32  ;;  %s485_s5 = sshll.u32 (!%p162_p10), %s618_s15, 10 }
  0x10   : > { %s755_s10 = scalar_lea.hbm (!%p162_p10), %s811_s3, %s485_s5 }
  0x14   : > { %v628_v0 = vmov 0.0   ;;  %v207_v1 = vld [vmem:[%s810_s2 + $0x10] sm:$0xff]  ;;  %s191_s28 = scalar_select %p190_p11, %s618_s15, 1  ;;  %v629_v2 = vmov 0   ;;  %v205_v3 = vld [vmem:[%s810_s2] sm:$0xff]  ;;  %v208_v4 = vld [vmem:[%s810_s2 + $0x18] sm:$0xff] }
  0x15   : > { %313 = vmatprep.mubr.f32.mxu0 %v628_v0  ;;  %325 = vmatprep.mubr.f32.mxu1 %v628_v0  ;;  %v206_v5 = vld [vmem:[%s810_s2 + $0x8] sm:$0xff]  ;;  %vm244_vm0 = vcmask 1043456   ;;  %v200_v8 = vld [vmem:[%s809_s1] sm:$0xff]  ;;  %vm231_vm1 = vcmask 31744   ;;  %v202_v9 = vld [vmem:[%s809_s1 + $0x10] sm:$0xff]  ;;  %s630_s15 = smov [#allocation2]  }
  0x16   : > { %548 = vset.pattern.permute.xlu1 %v629_v2  ;;  %547 = vset.pattern.permute.xlu0 %v629_v2  ;;  %s484_s4 = sshll.u32 %s191_s28, 3  ;;  %v201_v10 = vld [vmem:[%s809_s1 + $0x8] sm:$0xff]  ;;  %v203_v11 = vld [vmem:[%s809_s1 + $0x18] sm:$0xff]  ;;  %s554_s19 = sshll.u32 %s630_s15, 4  ;;  %s555_s19 = int_to_ptr.vmem [resolvable:$false] %s554_s19 }
  0x17   : > { %221 = vperm.xlu1 %548, %v207_v1   ;;  %211 = vperm.xlu0 %547, %v205_v3   ;;  %s197_s11 = scalar_lea.vmem %s808_s0, %s484_s4  ;;  %s470_s4 = sshll.u32 %s186_s30, 6 }
  0x18   : > { %v204_v6 = vld [vmem:[%s197_s11] sm:$0xff]  ;;  %s741_s6 = scalar_lea.vmem [#allocation2], %s470_s4  ;;  %s763_s11 = scalar_lea.sflag [#allocation3], %s186_s30 }
  0x19   : > { %v230_v7 = vcombine.high %v204_v6, %v204_v6  ;;  %s386_s7 = sshll.u32 %s741_s6, 4  ;;  %s556_s21 = scalar_lea.vmem %s555_s19, 2048  ;;  %s757_s7 = int_to_ptr.vmem [resolvable:$true] %s386_s7 }
  0x1a   : > { %s550_s18 = scalar_lea.vmem %s757_s7, 1024  ;;  %p557_p1 = scmp.lt.s32.totalorder %s757_s7, %s555_s19 }
  0x1b   : > { %226 = vperm.xlu1 %548, %v208_v4   ;;  %216 = vperm.xlu0 %547, %v206_v5   ;;  %p551_p12 = scmp.ne.s32.totalorder %s757_s7, %s550_s18  ;;  %p558_p2 = scmp.lt.s32.totalorder %s556_s21, %s550_s18 }
  0x1c   : > { %473 = vmatprep.subr.msk.mxu0 %vm244_vm0, %v230_v7  ;;  %486 = vmatprep.subr.msk.mxu1 %vm244_vm0, %v230_v7 }
  0x1d   : > { %474 = vmatpush1.msk.msra.mxu0 %vm244_vm0, %v204_v6  ;;  %487 = vmatpush1.msk.msra.mxu1 %vm244_vm0, %v204_v6  ;;  %p552_p13 = pnand %p551_p12, %p693_p4  ;;  %p559_p3 = por %p558_p2, %p557_p1 }
  0x1e   : > { %475 = vmatmul.mubr.msk.f32.vlgmr.msra.gmra.mxu0 %vm231_vm1, %v200_v8  ;;  %477 = vmatmul.mubr.msk.f32.vlgmr.msra.gmra.mxu1 %vm231_vm1, %v202_v9 }
  0x1f   : > { %319 = vmatprep.mubr.f32.mxu0 %v628_v0  ;;  %331 = vmatprep.mubr.f32.mxu1 %v628_v0  ;;  %p553_p0 = pneg %p552_p13 }
  0x21   : > { %p560_p5 = pnand %p559_p3, %p553_p0 }
  0x22   : > { %476 = vmatmul.mubr.msk.f32.gmra.mxu0 %vm231_vm1, %v201_v10  ;;  %478 = vmatmul.mubr.msk.f32.gmra.mxu1 %vm231_vm1, %v203_v11 }
  0x92   : > { %v222_v12 = vpop.permute.xlu1 %221  ;;  %v212_v13 = vpop.permute.xlu0 %211 }
  0x96   : > { %v227_v22 = vpop.permute.xlu1 %226  ;;  %v217_v23 = vpop.permute.xlu0 %216 }
  0xde   : > { %v315_v14 = vpop.f32.mrf.mxu0  ;;  %v327_v15 = vpop.f32.mrf.mxu1 }
  0xdf   : > { %v316_v16 = vadd.f32 %v315_v14, %v212_v13  ;;  %v328_v17 = vadd.f32 %v327_v15, %v222_v12 }
  0xe0   : > { %v317_v18 = vpop.f32.mrf.mxu0  ;;  %v329_v19 = vpop.f32.mrf.mxu1 }
  0xe1   : > { %vm338_vm2 = vcmp.gt.f32.partialorder %v316_v16, 0.0  ;;  %v346_v20 = vmul.f32 0.2, %v316_v16  ;;  %vm342_vm3 = vcmp.gt.f32.partialorder %v328_v17, 0.0  ;;  %v350_v21 = vmul.f32 0.2, %v328_v17 }
  0xe2   : > { %v318_v24 = vadd.f32 %v317_v18, %v212_v13  ;;  %v330_v25 = vadd.f32 %v329_v19, %v222_v12  ;;  %v321_v26 = vpop.f32.mrf.mxu0  ;;  %v333_v27 = vpop.f32.mrf.mxu1 }
  0xe3   : > { %v354_v28 = vsel %vm338_vm2, %v316_v16, %v346_v20  ;;  %v358_v29 = vsel %vm342_vm3, %v328_v17, %v350_v21  ;;  %v322_v30 = vadd.f32 %v321_v26, %v217_v23  ;;  %v334_v31 = vadd.f32 %v333_v27, %v227_v22 }
  0xe4   : > { %362 = vst [vmem:[%s741_s6] sm:$0xff] %v354_v28  ;;  %366 = vst [vmem:[%s741_s6 + $0x20] sm:$0xff] %v358_v29  ;;  %vm339_vm4 = vcmp.gt.f32.partialorder %v318_v24, 0.0  ;;  %v347_v32 = vmul.f32 0.2, %v318_v24  ;;  %vm343_vm5 = vcmp.gt.f32.partialorder %v330_v25, 0.0  ;;  %v323_v34 = vpop.f32.mrf.mxu0  ;;  %v335_v35 = vpop.f32.mrf.mxu1 }
  0xe5   : > { %v351_v33 = vmul.f32 0.2, %v330_v25  ;;  %vm340_vm6 = vcmp.gt.f32.partialorder %v322_v30, 0.0  ;;  %v348_v36 = vmul.f32 0.2, %v322_v30  ;;  %vm344_vm7 = vcmp.gt.f32.partialorder %v334_v31, 0.0 }
  0xe6   : > { %v352_v37 = vmul.f32 0.2, %v334_v31  ;;  %v355_v38 = vsel %vm339_vm4, %v318_v24, %v347_v32  ;;  %v324_v40 = vadd.f32 %v323_v34, %v217_v23  ;;  %v336_v41 = vadd.f32 %v335_v35, %v227_v22 }
  0xe7   : > { %v359_v39 = vsel %vm343_vm5, %v330_v25, %v351_v33  ;;  %363 = vst [vmem:[%s741_s6 + $0x8] sm:$0xff] %v355_v38  ;;  %v356_v42 = vsel %vm340_vm6, %v322_v30, %v348_v36 }
  0xe8   : > { %367 = vst [vmem:[%s741_s6 + $0x28] sm:$0xff] %v359_v39  ;;  %v360_v43 = vsel %vm344_vm7, %v334_v31, %v352_v37  ;;  %364 = vst [vmem:[%s741_s6 + $0x10] sm:$0xff] %v356_v42  ;;  %vm341_vm8 = vcmp.gt.f32.partialorder %v324_v40, 0.0  ;;  %v349_v44 = vmul.f32 0.2, %v324_v40  ;;  %vm345_vm9 = vcmp.gt.f32.partialorder %v336_v41, 0.0 }
  0xe9   : > { %368 = vst [vmem:[%s741_s6 + $0x30] sm:$0xff] %v360_v43  ;;  %v353_v45 = vmul.f32 0.2, %v336_v41 }
  0xea   : > { %v357_v46 = vsel %vm341_vm8, %v324_v40, %v349_v44 }
  0xeb   : > { %v361_v47 = vsel %vm345_vm9, %v336_v41, %v353_v45  ;;  %365 = vst [vmem:[%s741_s6 + $0x18] sm:$0xff] %v357_v46 }
  0xec   : > { %369 = vst [vmem:[%s741_s6 + $0x38] sm:$0xff] %v361_v47 }
  0xed   : > { %563 = shalt.err (!%p560_p5)
}
  0xee   : > { %s564_s23 = scalar_lea.hbm %s755_s10, 1024  ;;  %s568_s28 = scalar_lea.hbm %s811_s3, 2048 }
  0xef   : > { %p565_p6 = scmp.ne.s32.totalorder %s755_s10, %s564_s23  ;;  %p569_p10 = scmp.lt.s32.totalorder %s755_s10, %s811_s3 }
  0xf0   : > { %p570_p11 = scmp.lt.s32.totalorder %s568_s28, %s564_s23 }
  0xf1   : > { %p566_p7 = pnand %p565_p6, %p693_p4 }
  0xf2   : > { %p571_p12 = por %p570_p11, %p569_p10 }
  0xf3   : > { %p567_p9 = pneg %p566_p7 }
  0xf5   : > { %p572_p13 = pnand %p571_p12, %p567_p9 }
  0xf7   : > { %575 = shalt.err (!%p572_p13)
}
  0xf8   : > { %s631_s4 = smov 256   ;;  %s632_s5 = smov 16  }
  0xf9   : > { %488 = dma.vmem_to_hbm [thread:$0]  (%p693_p4), %s757_s7, 1024, %s755_s10, %s763_s11, %s631_s4, %s631_s4, %s632_s5  }
  0xfa PF: > { %p494_p0 = scmp.ge.s32.totalorder %s626_s17, 2  ;;  %s401_s6 = sand.u32 1, %s606_s12  }
  0xfb   : > { %s402_s8 = scalar_lea.sflag [#allocation3], %s401_s6 }
  0xfc   : > { %p491_p1 = pnand %p494_p0, %p700_p8 }
  0xfe   : > { %p492_p2 = pneg %p491_p1 }
 0x100   : > { %601 = dma.done.wait (%p492_p2), %s402_s8, 1024  }
 0x101   : > { %603 = vsyncadd (%p492_p2), %s402_s8, 4294966272  ;;  %s16_s17 = sadd.s32 1, %s626_s17   ;;  %s814_s12 = smov %s610_s13 }
 0x102   : > { %p13_p3 = scmp.ge.s32.totalorder %s16_s17, 4   ;;  %s815_s13 = smov %s614_s14 }
 0x103   : > { %s816_s14 = smov %s706_s25  ;;  %s817_s15 = smov %s622_s16 }
 0x104   : > { %s818_s16 = smov %s820_s20  ;;  %15 = sbr.rel (!%p13_p3) target bundleno = 4 (0x4), region = 67 }
 0x109   :  { %407 = vsyncpa [#allocation3], 1 }
 0x10a   :  { %409 = vsyncpa [#allocation3 + $0x1], 1 }

</bundles_post_ra>
